<compile_context>
chip_gen: v7x
topology: tpu7x:2x2x1
jax: 0.10.0
libtpu: 0.0.40
codegen_flags: <defaults>
</compile_context>

<pallas_src>
import functools

import jax
import jax.numpy as jnp
from jax import lax
from jax.experimental import pallas as pl
from jax.experimental.pallas import tpu as pltpu

LANES = 128
MAX_BLOCK_ROWS = 4096            # 4096 x 128 f32 = 2 MiB per pipeline buffer per input
VMEM_LIMIT_BYTES = 48 * 1024 * 1024


def _cdiv(a, b):
    return -(-a // b)


def _round_up(a, b):
    return _cdiv(a, b) * b


def _row_align(dtype):
    # Native sublane tiling: 4-byte -> (8,128), 2-byte -> (16,128), 1-byte -> (32,128).
    return {4: 8, 2: 16, 1: 32}.get(jnp.dtype(dtype).itemsize, 8)


def _num_tensorcores():
    # v5e / v6e: 1 TensorCore per chip; v7x: 2.  Best-effort string probe.
    try:
        kind = jax.devices()[0].device_kind.lower()
    except Exception:
        return 1
    return 2 if "v7" in kind else 1


def _combo_loss_kernel(p_ref, y_ref, out_ref, *, block_rows, rows,
                       blocks_per_split, binary_targets, has_partial):
    s = pl.program_id(0)
    i = pl.program_id(1)

    @pl.when(i == 0)
    def _():
        out_ref[...] = jnp.zeros_like(out_ref)

    def accumulate(masked):
        p = p_ref[...].astype(jnp.float32)
        y = y_ref[...].astype(jnp.float32)

        if binary_targets:
            # One log per element; exact only for hard 0/1 targets.
            bce = -jnp.maximum(jnp.log(jnp.where(y > 0.5, p, 1.0 - p)), -100.0)
        else:
            # torch.nn.BCELoss clamps the log terms at -100.  Refactored form
            # (2 fewer VALU ops/elem):  -(y*log p + (1-y)*log(1-p)).
            log_p = jnp.maximum(jnp.log(p), -100.0)
            log_1mp = jnp.maximum(jnp.log(1.0 - p), -100.0)
            bce = y * (log_1mp - log_p) - log_1mp

        py = p * y

        if masked:
            # Zero out rows beyond the valid range (partial last block or a
            # fully-phantom block of the other core's split).
            rem = rows - (s * blocks_per_split + i) * block_rows
            row_ids = lax.broadcasted_iota(jnp.int32, (block_rows, LANES), 0)
            m = row_ids < rem
            zero = jnp.float32(0.0)
            bce = jnp.where(m, bce, zero)
            py = jnp.where(m, py, zero)
            p = jnp.where(m, p, zero)
            y = jnp.where(m, y, zero)

        # Fold each quantity to a single (8,128) vreg with VPU adds only and
        # accumulate directly into its slice (no jnp.stack relayout).
        r = block_rows // 8
        out_ref[0] += bce.reshape(r, 8, LANES).sum(axis=0)
        out_ref[1] += py.reshape(r, 8, LANES).sum(axis=0)
        out_ref[2] += p.reshape(r, 8, LANES).sum(axis=0)
        out_ref[3] += y.reshape(r, 8, LANES).sum(axis=0)

    if not has_partial:
        accumulate(False)
    else:
        rem = rows - (s * blocks_per_split + i) * block_rows
        full = rem >= block_rows

        @pl.when(full)
        def _():
            accumulate(False)

        @pl.when(jnp.logical_not(full))
        def _():
            accumulate(True)


def combo_loss(predicted, actual, *, smooth=1e-6, alpha=0.5, gamma=0.5,
               assume_binary_targets=False, nsplit=None,
               max_block_rows=MAX_BLOCK_ROWS):
    """JAX/Pallas equivalent of ComboLoss.forward. Returns a scalar f32."""
    p = jnp.ravel(predicted)
    y = jnp.ravel(actual)
    if p.dtype == jnp.bool_:
        p = p.astype(jnp.uint8)
    if y.dtype == jnp.bool_:
        y = y.astype(jnp.uint8)
    n_elems = p.shape[0]
    if n_elems == 0:
        # torch.nn.BCELoss(reduction='mean') over an empty tensor yields NaN.
        return jnp.float32(jnp.nan)

    # Auto single-log path for hard masks (bool/int dtypes carry 0/1 targets).
    binary_targets = bool(assume_binary_targets) or jnp.issubdtype(
        y.dtype, jnp.integer)

    num_cores = _num_tensorcores()
    if nsplit is None:
        nsplit = num_cores            # 1 on v5e/v6e, 2 on v7x
    nsplit = max(1, int(nsplit))

    row_align = max(_row_align(p.dtype), _row_align(y.dtype))
    align_elems = row_align * LANES
    n_pad = (-n_elems) % align_elems
    if n_pad:
        # Only pad to the native (sublane x 128) tile, and only when needed.
        # Zero padding (p=0, y=0) contributes exactly 0 to every sum on both
        # BCE paths, so no extra masking is required for it.
        # TODO(synk): a fully pad-free path for N % (row_align*128) != 0 would
        # need manual DMA of a ragged tail; not worth it for this kernel.
        p = jnp.pad(p, (0, n_pad))
        y = jnp.pad(y, (0, n_pad))
    rows = p.shape[0] // LANES               # multiple of row_align
    p2 = p.reshape(rows, LANES)              # free reshape, no data movement
    y2 = y.reshape(rows, LANES)

    block_rows = min(_round_up(max(int(max_block_rows), 1), row_align),
                     _round_up(_cdiv(rows, nsplit), row_align))
    num_blocks = _cdiv(rows, block_rows)
    blocks_per_split = _cdiv(num_blocks, nsplit)
    # Any grid step whose block extends past `rows` (partial last block or a
    # phantom block of an uneven split) must take the masked path.
    has_partial = (nsplit * blocks_per_split * block_rows) != rows

    kernel = functools.partial(
        _combo_loss_kernel,
        block_rows=block_rows, rows=rows,
        blocks_per_split=blocks_per_split,
        binary_targets=binary_targets,
        has_partial=has_partial)

    def in_map(s, i):
        b = s * blocks_per_split + i
        # Clamp phantom block indices in-bounds (their contribution is masked
        # to zero in-kernel), so the auto-generated DMA never goes OOB.
        return (jnp.minimum(b, num_blocks - 1), 0)

    n_proc = rows * LANES
    cost = pl.CostEstimate(
        flops=10 * n_proc,
        transcendentals=(1 if binary_targets else 2) * n_proc,
        bytes_accessed=(p2.size * p2.dtype.itemsize
                        + y2.size * y2.dtype.itemsize
                        + nsplit * 4 * 8 * LANES * 4))

    core_parallel = getattr(pltpu, "CORE_PARALLEL", None)
    arbitrary = getattr(pltpu, "ARBITRARY", "arbitrary")
    if nsplit == 2 and num_cores == 2 and core_parallel is not None:
        # v7x: shard the leading split axis across the two TensorCores; each
        # core owns its own (4,8,128) partial-accumulator output block.
        semantics = (core_parallel, arbitrary)
    else:
        semantics = ("arbitrary", "arbitrary")

    def _run(dim_sem):
        return pl.pallas_call(
            kernel,
            out_shape=jax.ShapeDtypeStruct((nsplit, 4, 8, LANES), jnp.float32),
            grid_spec=pltpu.PrefetchScalarGridSpec(
                num_scalar_prefetch=0,
                grid=(nsplit, blocks_per_split),
                in_specs=[
                    pl.BlockSpec((block_rows, LANES), in_map),
                    pl.BlockSpec((block_rows, LANES), in_map),
                ],
                out_specs=pl.BlockSpec((None, 4, 8, LANES),
                                       lambda s, i: (s, 0, 0, 0)),
            ),
            compiler_params=pltpu.CompilerParams(
                dimension_semantics=dim_sem,
                vmem_limit_bytes=VMEM_LIMIT_BYTES,
            ),
            cost_estimate=cost,
        )(p2, y2)

    try:
        partials = _run(semantics)
    except Exception:
        if semantics == ("arbitrary", "arbitrary"):
            raise
        partials = _run(("arbitrary", "arbitrary"))   # safe fallback

    # Tiny epilogue: one cross-lane reduction over (nsplit,4,8,128) -> 4
    # scalars, then the scalar BCE / Focal / Dice combine.
    sums = jnp.sum(partials, axis=(0, 2, 3))  # [sum bce, sum p*y, sum p, sum y]
    bce_loss = sums[0] / jnp.float32(n_elems)
    pt = jnp.exp(-bce_loss)
    focal_loss = alpha * (1.0 - pt) ** gamma * bce_loss
    dice_loss = 1.0 - (2.0 * sums[1] + smooth) / (sums[2] + sums[3] + smooth)
    return bce_loss + focal_loss + dice_loss


def _reference_combo_loss(predicted, actual, smooth=1e-6, alpha=0.5, gamma=0.5):
    p = jnp.ravel(predicted).astype(jnp.float32)
    y = jnp.ravel(actual).astype(jnp.float32)
    log_p = jnp.maximum(jnp.log(p), -100.0)
    log_1mp = jnp.maximum(jnp.log(1.0 - p), -100.0)
    bce = jnp.mean(-(y * log_p + (1.0 - y) * log_1mp))
    pt = jnp.exp(-bce)
    focal = alpha * (1.0 - pt) ** gamma * bce
    inter = jnp.sum(p * y)
    dice = 1.0 - (2.0 * inter + smooth) / (jnp.sum(p) + jnp.sum(y) + smooth)
    return bce + focal + dice


if __name__ == "__main__":
    key = jax.random.PRNGKey(0)
    k1, k2, k3, k4 = jax.random.split(key, 4)

    # 1) Segmentation-style input (NCHW in PyTorch), soft-target two-log path.
    predicted = jax.nn.sigmoid(jax.random.normal(k1, (2, 4, 16, 16), jnp.float32))
    actual = (jax.random.uniform(k2, (2, 4, 16, 16)) > 0.5).astype(jnp.float32)
    ref = _reference_combo_loss(predicted, actual)
    loss = combo_loss(predicted, actual)
    jax.block_until_ready(loss)
    assert jnp.allclose(loss, ref, rtol=1e-5, atol=1e-5), (loss, ref)

    # 2) Single-log path forced for hard 0/1 float masks.
    loss_bin = combo_loss(predicted, actual, assume_binary_targets=True)
    jax.block_until_ready(loss_bin)
    assert jnp.allclose(loss_bin, ref, rtol=1e-5, atol=1e-5), (loss_bin, ref)

    # 3) Narrow dtypes (bf16 preds, uint8 mask): auto single-log, 32-row tiles.
    pred_bf16 = predicted.astype(jnp.bfloat16)
    mask_u8 = actual.astype(jnp.uint8)
    loss_narrow = combo_loss(pred_bf16, mask_u8)
    jax.block_until_ready(loss_narrow)
    ref_narrow = _reference_combo_loss(pred_bf16.astype(jnp.float32),
                                       mask_u8.astype(jnp.float32))
    assert jnp.allclose(loss_narrow, ref_narrow, rtol=1e-5, atol=1e-5), (
        loss_narrow, ref_narrow)

    # 4) Partial final block (rows % block_rows != 0) via a small tile override.
    pred_b = jax.nn.sigmoid(jax.random.normal(k3, (2, 4, 16, 24), jnp.float32))
    act_b = (jax.random.uniform(k4, (2, 4, 16, 24)) > 0.5).astype(jnp.float32)
    ref_b = _reference_combo_loss(pred_b, act_b)
    loss_b = combo_loss(pred_b, act_b, max_block_rows=16)
    jax.block_until_ready(loss_b)
    assert jnp.allclose(loss_b, ref_b, rtol=1e-5, atol=1e-5), (loss_b, ref_b)

    # 5) Two-split grid with a fully-masked phantom trailing block.
    loss_c = combo_loss(pred_b, act_b, nsplit=2, max_block_rows=8)
    jax.block_until_ready(loss_c)
    assert jnp.allclose(loss_c, ref_b, rtol=1e-5, atol=1e-5), (loss_c, ref_b)

    # 6) Non-128-multiple element count (torch docstring shape): pad fallback.
    pred_d = jax.nn.sigmoid(jax.random.normal(k1, (10, 1), jnp.float32))
    act_d = (jax.random.uniform(k2, (10, 1)) > 0.5).astype(jnp.float32)
    ref_d = _reference_combo_loss(pred_d, act_d)
    loss_d = combo_loss(pred_d, act_d)
    jax.block_until_ready(loss_d)
    assert jnp.allclose(loss_d, ref_d, rtol=1e-5, atol=1e-5), (loss_d, ref_d)

    print("KERNEL_OK")
</pallas_src>

<mosaic_0001>
module attributes {stable_mosaic.version = 11 : i64} {
  func.func @_combo_loss_kernel(%arg0: i32, %arg1: i32, %arg2: memref<16x128xf32, #tpu.memory_space<vmem>>, %arg3: memref<16x128xf32, #tpu.memory_space<vmem>>, %arg4: memref<1x4x8x128xf32, #tpu.memory_space<vmem>>) attributes {dimension_semantics = [#tpu.dimension_semantics<arbitrary>, #tpu.dimension_semantics<arbitrary>], iteration_bounds = array<i64: 1, 1>, scalar_prefetch = 0 : i64, scratch_operands = 0 : i64, tpu.core_type = #tpu.core_type<tc>, window_params = [{transform_indices = @transform_0, window_bounds = array<i64: 16, 128>}, {transform_indices = @transform_1, window_bounds = array<i64: 16, 128>}, {transform_indices = @transform_2, window_bounds = array<i64: 1, 4, 8, 128>}]} {
    %c0_i32 = arith.constant 0 : i32
    %0 = arith.cmpi eq, %arg1, %c0_i32 : i32
    %1 = arith.extui %0 : i1 to i32
    %c0_i32_0 = arith.constant 0 : i32
    %2 = arith.cmpi ne, %1, %c0_i32_0 : i32
    scf.if %2 {
      %cst_39 = arith.constant 0.000000e+00 : f32
      %49 = vector.broadcast %cst_39 : f32 to vector<4x8x128xf32>
      %c0_40 = arith.constant 0 : index
      %c0_41 = arith.constant 0 : index
      %c0_42 = arith.constant 0 : index
      %c0_43 = arith.constant 0 : index
      %50 = vector.load %arg4[%c0_40, %c0_41, %c0_42, %c0_43] : memref<1x4x8x128xf32, #tpu.memory_space<vmem>>, vector<1x4x8x128xf32>
      %51 = vector.shape_cast %50 : vector<1x4x8x128xf32> to vector<4x8x128xf32>
      %52 = vector.shape_cast %49 : vector<4x8x128xf32> to vector<1x4x8x128xf32>
      tpu.vector_store %arg4[%c0_40, %c0_41, %c0_42, %c0_43], %52 {strides = array<i32>} : memref<1x4x8x128xf32, #tpu.memory_space<vmem>>, vector<1x4x8x128xf32>,
    } else {
    }
    %c0 = arith.constant 0 : index
    %c0_1 = arith.constant 0 : index
    %3 = vector.load %arg2[%c0, %c0_1] : memref<16x128xf32, #tpu.memory_space<vmem>>, vector<16x128xf32>
    %c0_2 = arith.constant 0 : index
    %c0_3 = arith.constant 0 : index
    %4 = vector.load %arg3[%c0_2, %c0_3] : memref<16x128xf32, #tpu.memory_space<vmem>>, vector<16x128xf32>
    %5 = math.log %3 : vector<16x128xf32>
    %cst = arith.constant -1.000000e+02 : f32
    %6 = vector.broadcast %cst : f32 to vector<16x128xf32>
    %7 = arith.maximumf %5, %6 : vector<16x128xf32>
    %cst_4 = arith.constant 1.000000e+00 : f32
    %8 = vector.broadcast %cst_4 : f32 to vector<16x128xf32>
    %9 = arith.subf %8, %3 : vector<16x128xf32>
    %10 = math.log %9 : vector<16x128xf32>
    %cst_5 = arith.constant -1.000000e+02 : f32
    %11 = vector.broadcast %cst_5 : f32 to vector<16x128xf32>
    %12 = arith.maximumf %10, %11 : vector<16x128xf32>
    %13 = arith.subf %12, %7 : vector<16x128xf32>
    %14 = arith.mulf %4, %13 : vector<16x128xf32>
    %15 = arith.subf %14, %12 : vector<16x128xf32>
    %16 = arith.mulf %3, %4 : vector<16x128xf32>
    %c0_6 = arith.constant 0 : index
    %c0_7 = arith.constant 0 : index
    %c0_8 = arith.constant 0 : index
    %c0_9 = arith.constant 0 : index
    %17 = vector.load %arg4[%c0_6, %c0_7, %c0_8, %c0_9] : memref<1x4x8x128xf32, #tpu.memory_space<vmem>>, vector<1x1x8x128xf32>
    %18 = vector.shape_cast %17 : vector<1x1x8x128xf32> to vector<8x128xf32>
    %19 = vector.shape_cast %15 : vector<16x128xf32> to vector<2x8x128xf32>
    %cst_10 = arith.constant dense<0.000000e+00> : vector<8x128xf32>
    %20 = vector.multi_reduction <add>, %19, %cst_10 [0] : vector<2x8x128xf32> to vector<8x128xf32>
    %21 = arith.addf %18, %20 : vector<8x128xf32>
    %c0_11 = arith.constant 0 : index
    %c0_12 = arith.constant 0 : index
    %c0_13 = arith.constant 0 : index
    %c0_14 = arith.constant 0 : index
    %22 = vector.load %arg4[%c0_11, %c0_12, %c0_13, %c0_14] : memref<1x4x8x128xf32, #tpu.memory_space<vmem>>, vector<1x1x8x128xf32>
    %23 = vector.shape_cast %22 : vector<1x1x8x128xf32> to vector<8x128xf32>
    %24 = vector.shape_cast %21 : vector<8x128xf32> to vector<1x1x8x128xf32>
    tpu.vector_store %arg4[%c0_11, %c0_12, %c0_13, %c0_14], %24 {strides = array<i32>} : memref<1x4x8x128xf32, #tpu.memory_space<vmem>>, vector<1x1x8x128xf32>,
    %c0_15 = arith.constant 0 : index
    %c1 = arith.constant 1 : index
    %c0_16 = arith.constant 0 : index
    %c0_17 = arith.constant 0 : index
    %25 = vector.load %arg4[%c0_15, %c1, %c0_16, %c0_17] : memref<1x4x8x128xf32, #tpu.memory_space<vmem>>, vector<1x1x8x128xf32>
    %26 = vector.shape_cast %25 : vector<1x1x8x128xf32> to vector<8x128xf32>
    %27 = vector.shape_cast %16 : vector<16x128xf32> to vector<2x8x128xf32>
    %cst_18 = arith.constant dense<0.000000e+00> : vector<8x128xf32>
    %28 = vector.multi_reduction <add>, %27, %cst_18 [0] : vector<2x8x128xf32> to vector<8x128xf32>
    %29 = arith.addf %26, %28 : vector<8x128xf32>
    %c0_19 = arith.constant 0 : index
    %c1_20 = arith.constant 1 : index
    %c0_21 = arith.constant 0 : index
    %c0_22 = arith.constant 0 : index
    %30 = vector.load %arg4[%c0_19, %c1_20, %c0_21, %c0_22] : memref<1x4x8x128xf32, #tpu.memory_space<vmem>>, vector<1x1x8x128xf32>
    %31 = vector.shape_cast %30 : vector<1x1x8x128xf32> to vector<8x128xf32>
    %32 = vector.shape_cast %29 : vector<8x128xf32> to vector<1x1x8x128xf32>
    tpu.vector_store %arg4[%c0_19, %c1_20, %c0_21, %c0_22], %32 {strides = array<i32>} : memref<1x4x8x128xf32, #tpu.memory_space<vmem>>, vector<1x1x8x128xf32>,
    %c0_23 = arith.constant 0 : index
    %c2 = arith.constant 2 : index
    %c0_24 = arith.constant 0 : index
    %c0_25 = arith.constant 0 : index
    %33 = vector.load %arg4[%c0_23, %c2, %c0_24, %c0_25] : memref<1x4x8x128xf32, #tpu.memory_space<vmem>>, vector<1x1x8x128xf32>
    %34 = vector.shape_cast %33 : vector<1x1x8x128xf32> to vector<8x128xf32>
    %35 = vector.shape_cast %3 : vector<16x128xf32> to vector<2x8x128xf32>
    %cst_26 = arith.constant dense<0.000000e+00> : vector<8x128xf32>
    %36 = vector.multi_reduction <add>, %35, %cst_26 [0] : vector<2x8x128xf32> to vector<8x128xf32>
    %37 = arith.addf %34, %36 : vector<8x128xf32>
    %c0_27 = arith.constant 0 : index
    %c2_28 = arith.constant 2 : index
    %c0_29 = arith.constant 0 : index
    %c0_30 = arith.constant 0 : index
    %38 = vector.load %arg4[%c0_27, %c2_28, %c0_29, %c0_30] : memref<1x4x8x128xf32, #tpu.memory_space<vmem>>, vector<1x1x8x128xf32>
    %39 = vector.shape_cast %38 : vector<1x1x8x128xf32> to vector<8x128xf32>
    %40 = vector.shape_cast %37 : vector<8x128xf32> to vector<1x1x8x128xf32>
    tpu.vector_store %arg4[%c0_27, %c2_28, %c0_29, %c0_30], %40 {strides = array<i32>} : memref<1x4x8x128xf32, #tpu.memory_space<vmem>>, vector<1x1x8x128xf32>,
    %c0_31 = arith.constant 0 : index
    %c3 = arith.constant 3 : index
    %c0_32 = arith.constant 0 : index
    %c0_33 = arith.constant 0 : index
    %41 = vector.load %arg4[%c0_31, %c3, %c0_32, %c0_33] : memref<1x4x8x128xf32, #tpu.memory_space<vmem>>, vector<1x1x8x128xf32>
    %42 = vector.shape_cast %41 : vector<1x1x8x128xf32> to vector<8x128xf32>
    %43 = vector.shape_cast %4 : vector<16x128xf32> to vector<2x8x128xf32>
    %cst_34 = arith.constant dense<0.000000e+00> : vector<8x128xf32>
    %44 = vector.multi_reduction <add>, %43, %cst_34 [0] : vector<2x8x128xf32> to vector<8x128xf32>
    %45 = arith.addf %42, %44 : vector<8x128xf32>
    %c0_35 = arith.constant 0 : index
    %c3_36 = arith.constant 3 : index
    %c0_37 = arith.constant 0 : index
    %c0_38 = arith.constant 0 : index
    %46 = vector.load %arg4[%c0_35, %c3_36, %c0_37, %c0_38] : memref<1x4x8x128xf32, #tpu.memory_space<vmem>>, vector<1x1x8x128xf32>
    %47 = vector.shape_cast %46 : vector<1x1x8x128xf32> to vector<8x128xf32>
    %48 = vector.shape_cast %45 : vector<8x128xf32> to vector<1x1x8x128xf32>
    tpu.vector_store %arg4[%c0_35, %c3_36, %c0_37, %c0_38], %48 {strides = array<i32>} : memref<1x4x8x128xf32, #tpu.memory_space<vmem>>, vector<1x1x8x128xf32>,
    return
  }
  func.func @transform_0(%arg0: i32, %arg1: i32) -> (i32, i32) {
    %c1_i32 = arith.constant 1 : i32
    %0 = arith.muli %arg0, %c1_i32 : i32
    %1 = arith.addi %0, %arg1 : i32
    %c0_i32 = arith.constant 0 : i32
    %2 = arith.minsi %1, %c0_i32 : i32
    %c0_i32_0 = arith.constant 0 : i32
    %c0_i32_1 = arith.constant 0 : i32
    return %2, %c0_i32_0 : i32, i32
  }
  func.func @transform_1(%arg0: i32, %arg1: i32) -> (i32, i32) {
    %c1_i32 = arith.constant 1 : i32
    %0 = arith.muli %arg0, %c1_i32 : i32
    %1 = arith.addi %0, %arg1 : i32
    %c0_i32 = arith.constant 0 : i32
    %2 = arith.minsi %1, %c0_i32 : i32
    %c0_i32_0 = arith.constant 0 : i32
    %c0_i32_1 = arith.constant 0 : i32
    return %2, %c0_i32_0 : i32, i32
  }
  func.func @transform_2(%arg0: i32, %arg1: i32) -> (i32, i32, i32, i32) {
    %c0_i32 = arith.constant 0 : i32
    %c0_i32_0 = arith.constant 0 : i32
    %c0_i32_1 = arith.constant 0 : i32
    %c0_i32_2 = arith.constant 0 : i32
    return %arg0, %c0_i32, %c0_i32_0, %c0_i32_1 : i32, i32, i32, i32
  }
}

</mosaic_0001>

<bundles_post_ra>
// kernel: tpu_custom_call.1
= control target key start
LH: loop header
LB: loop body
LE: loop exit
PB: predicated region body
PF: predicated region fallthrough
CT: control target
= control target key end

     0   :  { %7 = vsyncpa [#allocation3], 0  ;;  %s286_s0 = inlined_call_operand.hbm [shape: f32[16,128], index: 0, kind: input, shape index: {}]   ;;  %s287_s1 = inlined_call_operand.hbm [shape: f32[16,128], index: 1, kind: input, shape index: {}]   ;;  %s288_s2 = inlined_call_operand.hbm [shape: f32[1,4,8,128], index: 2, kind: output, shape index: {}]  }
   0x1   :  { %8 = vsyncpa [#allocation6], 0 }
   0x2   :  { %9 = vsyncpa [#allocation4], 0  ;;  %s221_s9 = smov [#allocation2]   ;;  %s149_s13 = scalar_lea.hbm %s286_s0, 256 }
   0x3   :  { %s21_s10 = sshll.u32 %s221_s9, 4  ;;  %p150_p0 = scmp.ne.s32.totalorder %s286_s0, %s149_s13  ;;  %s22_s10 = int_to_ptr.vmem [resolvable:$true] %s21_s10 }
   0x4   :  { %p153_p1 = scmp.lt.u32.totalorder %s149_s13, %s286_s0 }
   0x6   :  { %p155_p2 = pnand %p153_p1, %p150_p0 }
   0x8   :  { %158 = shalt.err (!%p155_p2)
}
   0x9   :  { %s159_s18 = scalar_lea.vmem %s22_s10, 256  ;;  %p164_p4 = scmp.lt.s32.totalorder %s22_s10, %s22_s10 }
   0xa   :  { %p160_p3 = scmp.ne.s32.totalorder %s22_s10, %s159_s18  ;;  %p165_p5 = scmp.lt.s32.totalorder %s159_s18, %s159_s18 }
   0xc   :  { %p166_p6 = por %p165_p5, %p164_p4 }
   0xe   :  { %p167_p7 = pnand %p166_p6, %p160_p3 }
  0x10   :  { %170 = shalt.err (!%p167_p7)
}
  0x11   :  { %s222_s19 = smov 128   ;;  %s223_s20 = smov 8  }
  0x12   :  { %27 = dma.hbm_to_vmem [thread:$0]  %s286_s0, 256, %s22_s10, [#allocation3], %s222_s19, %s222_s19, %s223_s20  }
  0x13   :  { %s224_s23 = smov [#allocation5]   ;;  %s171_s27 = scalar_lea.hbm %s287_s1, 256 }
  0x14   :  { %s39_s24 = sshll.u32 %s224_s23, 4  ;;  %p172_p8 = scmp.ne.s32.totalorder %s287_s1, %s171_s27  ;;  %s40_s24 = int_to_ptr.vmem [resolvable:$true] %s39_s24 }
  0x15   :  { %p175_p9 = scmp.lt.u32.totalorder %s171_s27, %s287_s1 }
  0x17   :  { %p177_p10 = pnand %p175_p9, %p172_p8 }
  0x19   :  { %180 = shalt.err (!%p177_p10)
}
  0x1a   :  { %s181_s4 = scalar_lea.vmem %s40_s24, 256  ;;  %p186_p12 = scmp.lt.s32.totalorder %s40_s24, %s40_s24 }
  0x1b   :  { %p182_p11 = scmp.ne.s32.totalorder %s40_s24, %s181_s4  ;;  %p187_p13 = scmp.lt.s32.totalorder %s181_s4, %s181_s4 }
  0x1d   :  { %p188_p0 = por %p187_p13, %p186_p12 }
  0x1f   :  { %p189_p1 = pnand %p188_p0, %p182_p11 }
  0x21   :  { %192 = shalt.err (!%p189_p1)
}
  0x22   :  { %45 = dma.hbm_to_vmem [thread:$0]  %s287_s1, 256, %s40_s24, [#allocation6], %s222_s19, %s222_s19, %s223_s20  }
  0x23   :  { %215 = dma.done.wait [#allocation3], 256  }
  0x24   :  { %216 = vsyncadd [#allocation3], 4294967040 }
  0x25   :  { %217 = dma.done.wait [#allocation6], 256  }
  0x26   :  { %218 = vsyncadd [#allocation6], 4294967040  ;;  %v68_v0 = vld [vmem:[#allocation2] sm:$0xff]  ;;  %v69_v1 = vld [vmem:[#allocation2 + $0x8] sm:$0xff]  ;;  %s225_s1 = smov [#allocation7]  }
  0x27   :  { %v70_v2 = vld [vmem:[#allocation5] sm:$0xff]  ;;  %v71_v3 = vld [vmem:[#allocation5 + $0x8] sm:$0xff]  ;;  %141 = vlog2.f32 %v68_v0  ;;  %v78_v4 = vsub.f32 1.0, %v68_v0  ;;  %v79_v5 = vsub.f32 1.0, %v69_v1  ;;  %v105_v8 = vadd.f32 %v69_v1, %v68_v0  ;;  %s118_s6 = sshll.u32 %s225_s1, 4  ;;  %s119_s6 = int_to_ptr.vmem [resolvable:$true] %s118_s6 }
  0x28   :  { %v92_v6 = vmul.f32 %v70_v2, %v68_v0  ;;  %143 = vlog2.f32 %v69_v1  ;;  %v93_v7 = vmul.f32 %v71_v3, %v69_v1  ;;  %v110_v9 = vadd.f32 %v71_v3, %v70_v2  ;;  %s193_s7 = scalar_lea.vmem %s119_s6, 512  ;;  %p198_p3 = scmp.lt.s32.totalorder %s119_s6, %s119_s6 }
  0x29   :  { %145 = vlog2.f32 %v78_v4  ;;  %107 = vst [vmem:[#allocation7 + $0x10] sm:$0xff] %v105_v8  ;;  %p194_p2 = scmp.ne.s32.totalorder %s119_s6, %s193_s7  ;;  %p199_p4 = scmp.lt.s32.totalorder %s193_s7, %s193_s7 }
  0x2a   :  { %147 = vlog2.f32 %v79_v5  ;;  %v100_v10 = vadd.f32 %v93_v7, %v92_v6  ;;  %112 = vst [vmem:[#allocation7 + $0x18] sm:$0xff] %v110_v9 }
  0x2b   :  { %p200_p5 = por %p199_p4, %p198_p3 }
  0x2c   :  { %102 = vst [vmem:[#allocation7 + $0x8] sm:$0xff] %v100_v10 }
  0x2d   :  { %p201_p6 = pnand %p200_p5, %p194_p2 }
  0x31   :  { %v142_v11 = vpop.eup %141 }
  0x32   :  { %v144_v12 = vpop.eup %143  ;;  %v73_v13 = vmul.f32 0.6931472, %v142_v11 }
  0x33   :  { %v146_v14 = vpop.eup %145  ;;  %v75_v15 = vmul.f32 0.6931472, %v144_v12 }
  0x34   :  { %v148_v16 = vpop.eup %147  ;;  %v76_v17 = vmax.f32 %v73_v13, -100.0  ;;  %v81_v18 = vmul.f32 0.6931472, %v146_v14 }
  0x35   :  { %v77_v19 = vmax.f32 %v75_v15, -100.0  ;;  %v83_v20 = vmul.f32 0.6931472, %v148_v16 }
  0x36   :  { %v84_v21 = vmax.f32 %v81_v18, -100.0 }
  0x37   :  { %v85_v22 = vmax.f32 %v83_v20, -100.0 }
  0x38   :  { %v86_v23 = vsub.f32 %v84_v21, %v76_v17 }
  0x39   :  { %v87_v24 = vsub.f32 %v85_v22, %v77_v19 }
  0x3a   :  { %v88_v25 = vmul.f32 %v86_v23, %v70_v2 }
  0x3b   :  { %v89_v26 = vmul.f32 %v87_v24, %v71_v3 }
  0x3c   :  { %v90_v27 = vsub.f32 %v88_v25, %v84_v21 }
  0x3d   :  { %v91_v28 = vsub.f32 %v89_v26, %v85_v22 }
  0x3f   :  { %v95_v29 = vadd.f32 %v91_v28, %v90_v27 }
  0x41   :  { %97 = vst [vmem:[#allocation7] sm:$0xff] %v95_v29 }
  0x42   :  { %204 = shalt.err (!%p201_p6)
}
  0x43   :  { %s205_s10 = scalar_lea.hbm %s288_s2, 512 }
  0x44   :  { %p206_p7 = scmp.ne.s32.totalorder %s288_s2, %s205_s10  ;;  %p209_p8 = scmp.lt.u32.totalorder %s205_s10, %s288_s2 }
  0x46   :  { %p211_p9 = pnand %p209_p8, %p206_p7 }
  0x48   :  { %214 = shalt.err (!%p211_p9)
}
  0x49   :  { %124 = dma.vmem_to_hbm [thread:$0]  %s119_s6, 512, %s288_s2, [#allocation4], %s222_s19, %s222_s19, %s223_s20  }
  0x4a   :  { %219 = dma.done.wait [#allocation4], 512  }
  0x4b   :  { %220 = vsyncadd [#allocation4], 4294966784 }
  0x4c   :  { %128 = vsyncpa [#allocation3], 1 }
  0x4d   :  { %129 = vsyncpa [#allocation6], 1 }
  0x4e   :  { %130 = vsyncpa [#allocation4], 1 }

</bundles_post_ra>
